<compile_context>
chip_gen: v6e
topology: v6e:2x2x1
jax: 0.10.0
libtpu: 0.0.40
codegen_flags: <defaults>
</compile_context>

<pallas_src>
import functools

import jax
import jax.numpy as jnp
import numpy as np
from jax.experimental import pallas as pl
from jax.experimental.pallas import tpu as pltpu


# ----------------------------- Pallas kernel --------------------------------

def _decode_block_kernel(x_ref, w_ref, fold_ref, g_ref, b_ref,
                         o_ref, mean_ref, var_ref, xp_ref, *,
                         n, h, w, fi, fo, eps):
    """Fused ConvTranspose2d(4,2,1,bias=False) + ReLU + BatchNorm2d (batch stats).

    x_ref    : (n, h, w*fi)           NHWC input, minor dims merged
    w_ref    : (3, (w+2)*fi, 4*w*fo)  block-Toeplitz weights, one block per
                                      vertical tap u; columns ordered (a, r, b, c)
    fold_ref : (4*w*fo, fo)           0/1 matrix: output column -> its channel
    g_ref    : (1, 4*w*fo)            BN gamma, pre-tiled to the column layout
    b_ref    : (1, 4*w*fo)            BN beta,  pre-tiled to the column layout
    o_ref    : (n*h, 4*w*fo)          rows (n,q); cols (a,r,b,c) == NHWC after a
                                      pure reshape to (n, 2h, 2w, fo)
    mean_ref : (1, fo)                batch mean (for running-stat updates)
    var_ref  : (1, fo)                batch variance (biased, as used to normalise)
    xp_ref   : VMEM scratch (n, h+2, (w+2)*fi): zero-padded input halo
    """
    m = n * h
    kdim = (w + 2) * fi
    cols = 4 * w * fo
    groups = 4 * w                       # column positions per channel

    # --- 1-pixel zero-pad halo built in VMEM (no XLA pad, no extra HBM pass).
    xp_ref[...] = jnp.zeros_like(xp_ref)
    xp_ref[:, 1:1 + h, fi:fi + w * fi] = x_ref[...]

    # --- ConvTranspose2d: 3 accumulated MXU matmuls, one per vertical tap u.
    #     Each operand is a sublane window of the padded input (lane layout
    #     unchanged -> no relayout); K = (w+2)*fi, Ncols = 4*w*fo.
    acc = jnp.zeros((m, cols), dtype=jnp.float32)
    for u in range(3):                                   # static unroll
        lhs = xp_ref[:, u:u + h, :].reshape(m, kdim)
        acc = acc + jnp.dot(lhs, w_ref[u],
                            preferred_element_type=jnp.float32)

    # --- ReLU.
    y = jnp.maximum(acc, 0.0)

    # --- BatchNorm2d (training-mode batch statistics) while y is in VMEM.
    #     Per-channel reduction = one (m, cols)@(cols, fo) fold matmul + a
    #     sublane reduce; shifted two-pass variance for numerical robustness.
    inv_cnt = 1.0 / float(m * groups)                    # = N*(2H)*(2W) per channel
    fold = fold_ref[...]
    mean_c = jnp.sum(jnp.dot(y, fold, preferred_element_type=jnp.float32),
                     axis=0, keepdims=True) * inv_cnt                  # (1, fo)
    d = y - jnp.tile(mean_c, (1, groups))                              # (m, cols)
    var_c = jnp.sum(jnp.dot(d * d, fold, preferred_element_type=jnp.float32),
                    axis=0, keepdims=True) * inv_cnt                   # (1, fo)
    scale = g_ref[...] * jnp.tile(jax.lax.rsqrt(var_c + eps), (1, groups))
    o_ref[...] = (d * scale + b_ref[...]).astype(o_ref.dtype)          # single FMA
    mean_ref[...] = mean_c
    var_ref[...] = var_c


# --------------------------- parameter preparation ---------------------------

def prepare_decode_block_params(conv_w, width):
    """One-time host-side (numpy) re-layout of the ConvTranspose2d weight.

    Returns (w_big, fold):
      w_big : (3, (W+2)*fi, 4*W*fo) block-Toeplitz per-vertical-tap weights;
              output columns ordered (a, r, b, c), i.e. output pixel
              (2q+a, 2r+b, c) of batch-row (n, q) lands at column
              a*2*W*fo + (2r+b)*fo + c, so the stride-2 sub-pixel interleave
              becomes a pure reshape of the kernel output.
      fold  : (4*W*fo, fo) 0/1 matrix mapping each output column to its channel.
    """
    cw = np.asarray(conv_w)                    # (fi, fo, 4, 4)  PyTorch layout
    fi, fo = cw.shape[0], cw.shape[1]
    W = int(width)
    cols = 4 * W * fo
    # Sub-pixel mapping for ConvTranspose2d(k=4, s=2, p=1): output row 2q+a
    # reads padded input row q+u with kernel row ky (same for cols / v / kx).
    sub = {0: {0: 3, 1: 1}, 1: {1: 2, 2: 0}}   # a (or b) -> {u (or v) -> ky (kx)}
    wb = np.zeros((3, W + 2, fi, 2, W, 2, fo), np.float32)
    for a in (0, 1):
        for u, ky in sub[a].items():
            for b in (0, 1):
                for v, kx in sub[b].items():
                    for r in range(W):
                        wb[u, r + v, :, a, r, b, :] = cw[:, :, ky, kx]
    wb = wb.reshape(3, (W + 2) * fi, cols)
    fold = np.zeros((cols, fo), np.float32)
    fold[np.arange(cols), np.arange(cols) % fo] = 1.0
    return jnp.asarray(wb), jnp.asarray(fold)


# ------------------------------- forward -------------------------------------

@functools.partial(jax.jit, static_argnames=("eps",))
def decode_block_forward(x_nhwc, params, gamma, beta, eps=1e-5):
    """DecodeBlock forward.  NHWC in, NHWC out (a stacked decoder should stay
    NHWC end-to-end; see the perf notes at the top of this file).

    Returns (out_nhwc, batch_mean, batch_var)."""
    w_big, fold = params
    N, H, W, fi = x_nhwc.shape
    fo = fold.shape[1]
    cols = 4 * W * fo
    assert w_big.shape == (3, (W + 2) * fi, cols)

    x3 = x_nhwc.reshape(N, H, W * fi)          # free reshape, no transpose / pad
    g_cols = jnp.tile(gamma.reshape(1, fo).astype(jnp.float32), (1, cols // fo))
    b_cols = jnp.tile(beta.reshape(1, fo).astype(jnp.float32), (1, cols // fo))

    out2d, mean_c, var_c = pl.pallas_call(
        functools.partial(_decode_block_kernel,
                          n=N, h=H, w=W, fi=fi, fo=fo, eps=eps),
        out_shape=(
            jax.ShapeDtypeStruct((N * H, cols), x_nhwc.dtype),
            jax.ShapeDtypeStruct((1, fo), jnp.float32),
            jax.ShapeDtypeStruct((1, fo), jnp.float32),
        ),
        grid_spec=pltpu.PrefetchScalarGridSpec(
            num_scalar_prefetch=0,
            grid=(1,),
            # Everything fits in VMEM with large margin at these sizes, so one
            # grid step / one block per operand.  Scale-up: tile N*H with a
            # leading "parallel" axis (2nd TC on v7x) and reduce partial BN
            # stats across tiles before normalising.
            in_specs=[
                pl.BlockSpec((N, H, W * fi), lambda i: (0, 0, 0)),
                pl.BlockSpec((3, (W + 2) * fi, cols), lambda i: (0, 0, 0)),
                pl.BlockSpec((cols, fo), lambda i: (0, 0)),
                pl.BlockSpec((1, cols), lambda i: (0, 0)),
                pl.BlockSpec((1, cols), lambda i: (0, 0)),
            ],
            out_specs=[
                pl.BlockSpec((N * H, cols), lambda i: (0, 0)),
                pl.BlockSpec((1, fo), lambda i: (0, 0)),
                pl.BlockSpec((1, fo), lambda i: (0, 0)),
            ],
            scratch_shapes=[
                pltpu.VMEM((N, H + 2, (W + 2) * fi), jnp.float32),
            ],
        ),
        compiler_params=pltpu.CompilerParams(
            dimension_semantics=("arbitrary",)),
    )(x3, w_big, fold, g_cols, b_cols)

    # Pure reshape: rows (n, q) x cols (a, r, b, c)  ==  (n, 2q+a, 2r+b, c).
    out_nhwc = out2d.reshape(N, 2 * H, 2 * W, fo)
    # TODO(synk): the BatchNorm running_mean/running_var momentum update is a
    # training-time buffer side effect left to the caller (batch mean/var are
    # returned for that purpose; PyTorch uses the unbiased variance there).
    return out_nhwc, mean_c.reshape(fo), var_c.reshape(fo)


# ------------------------------ reference ------------------------------------

def decode_block_ref(x_nchw, conv_w, gamma, beta, eps=1e-5):
    # ConvTranspose2d(k=4,s=2,p=1,bias=False) via lhs-dilated conv, flipped kernel.
    rhs = jnp.transpose(jnp.flip(conv_w, (2, 3)), (1, 0, 2, 3))   # (fo, fi, k, k)
    y = jax.lax.conv_general_dilated(
        x_nchw, rhs, window_strides=(1, 1), padding=((2, 2), (2, 2)),
        lhs_dilation=(2, 2), rhs_dilation=(1, 1),
        dimension_numbers=('NCHW', 'OIHW', 'NCHW'))
    y = jnp.maximum(y, 0.0)
    mean = jnp.mean(y, axis=(0, 2, 3), keepdims=True)
    var = jnp.mean((y - mean) ** 2, axis=(0, 2, 3), keepdims=True)
    out = ((y - mean) / jnp.sqrt(var + eps) * gamma.reshape(1, -1, 1, 1)
           + beta.reshape(1, -1, 1, 1))
    return out, mean.reshape(-1), var.reshape(-1)


# --------------------------------- main ---------------------------------------

if __name__ == "__main__":
    N, fi, fo, H, W = 2, 8, 8, 8, 8
    key = jax.random.PRNGKey(0)
    kx, kw, kg, kb = jax.random.split(key, 4)

    x_nchw = jax.random.normal(kx, (N, fi, H, W), dtype=jnp.float32)
    # ConvTranspose2d weight layout: (in_channels, out_channels, kH, kW), no bias.
    conv_w = jax.random.normal(kw, (fi, fo, 4, 4), dtype=jnp.float32) * 0.1
    gamma = 1.0 + 0.1 * jax.random.normal(kg, (fo,), dtype=jnp.float32)
    beta = 0.1 * jax.random.normal(kb, (fo,), dtype=jnp.float32)

    params = prepare_decode_block_params(conv_w, W)

    # The fused kernel (and a real stacked decoder) is NHWC end-to-end; the
    # transpose below is test-harness glue to compare with the NCHW reference.
    x_nhwc = jnp.transpose(x_nchw, (0, 2, 3, 1))
    out_nhwc, mean_c, var_c = decode_block_forward(x_nhwc, params, gamma, beta)
    out_nhwc = jax.block_until_ready(out_nhwc)

    ref_nchw, ref_mean, ref_var = decode_block_ref(x_nchw, conv_w, gamma, beta)
    np.testing.assert_allclose(
        np.asarray(out_nhwc),
        np.asarray(jnp.transpose(ref_nchw, (0, 2, 3, 1))),
        rtol=2e-4, atol=2e-4)
    np.testing.assert_allclose(np.asarray(mean_c), np.asarray(ref_mean),
                               rtol=2e-4, atol=1e-5)
    np.testing.assert_allclose(np.asarray(var_c), np.asarray(ref_var),
                               rtol=2e-4, atol=1e-5)

    print("KERNEL_OK")
</pallas_src>

<mosaic_0001>
module attributes {stable_mosaic.version = 11 : i64} {
  func.func @_decode_block_kernel(%arg0: i32, %arg1: memref<2x8x64xf32, #tpu.memory_space<vmem>>, %arg2: memref<3x80x256xf32, #tpu.memory_space<vmem>>, %arg3: memref<256x8xf32, #tpu.memory_space<vmem>>, %arg4: memref<1x256xf32, #tpu.memory_space<vmem>>, %arg5: memref<1x256xf32, #tpu.memory_space<vmem>>, %arg6: memref<16x256xf32, #tpu.memory_space<vmem>>, %arg7: memref<1x8xf32, #tpu.memory_space<vmem>>, %arg8: memref<1x8xf32, #tpu.memory_space<vmem>>, %arg9: memref<2x10x80xf32, #tpu.memory_space<vmem>>) attributes {dimension_semantics = [#tpu.dimension_semantics<arbitrary>], iteration_bounds = array<i64: 1>, scalar_prefetch = 0 : i64, scratch_operands = 1 : i64, tpu.core_type = #tpu.core_type<tc>, window_params = [{pipeline_mode = #tpu.pipeline_mode<synchronous>, transform_indices = @transform_0, window_bounds = array<i64: 2, 8, 64>}, {pipeline_mode = #tpu.pipeline_mode<synchronous>, transform_indices = @transform_1, window_bounds = array<i64: 3, 80, 256>}, {pipeline_mode = #tpu.pipeline_mode<synchronous>, transform_indices = @transform_2, window_bounds = array<i64: 256, 8>}, {pipeline_mode = #tpu.pipeline_mode<synchronous>, transform_indices = @transform_3, window_bounds = array<i64: 1, 256>}, {pipeline_mode = #tpu.pipeline_mode<synchronous>, transform_indices = @transform_4, window_bounds = array<i64: 1, 256>}, {pipeline_mode = #tpu.pipeline_mode<synchronous>, transform_indices = @transform_5, window_bounds = array<i64: 16, 256>}, {pipeline_mode = #tpu.pipeline_mode<synchronous>, transform_indices = @transform_6, window_bounds = array<i64: 1, 8>}, {pipeline_mode = #tpu.pipeline_mode<synchronous>, transform_indices = @transform_7, window_bounds = array<i64: 1, 8>}]} {
    %cst = arith.constant 0.000000e+00 : f32
    %0 = vector.broadcast %cst : f32 to vector<2x10x80xf32>
    %c0 = arith.constant 0 : index
    %c0_0 = arith.constant 0 : index
    %c0_1 = arith.constant 0 : index
    %1 = vector.load %arg9[%c0, %c0_0, %c0_1] : memref<2x10x80xf32, #tpu.memory_space<vmem>>, vector<2x10x80xf32>
    tpu.vector_store %arg9[%c0, %c0_0, %c0_1], %0 {strides = array<i32>} : memref<2x10x80xf32, #tpu.memory_space<vmem>>, vector<2x10x80xf32>,
    %c0_2 = arith.constant 0 : index
    %c0_3 = arith.constant 0 : index
    %c0_4 = arith.constant 0 : index
    %2 = vector.load %arg1[%c0_2, %c0_3, %c0_4] : memref<2x8x64xf32, #tpu.memory_space<vmem>>, vector<2x8x64xf32>
    %c0_5 = arith.constant 0 : index
    %c1 = arith.constant 1 : index
    %c8 = arith.constant 8 : index
    %3 = vector.load %arg9[%c0_5, %c1, %c8] : memref<2x10x80xf32, #tpu.memory_space<vmem>>, vector<2x8x64xf32>
    tpu.vector_store %arg9[%c0_5, %c1, %c8], %2 {strides = array<i32>} : memref<2x10x80xf32, #tpu.memory_space<vmem>>, vector<2x8x64xf32>,
    %cst_6 = arith.constant 0.000000e+00 : f32
    %4 = vector.broadcast %cst_6 : f32 to vector<16x256xf32>
    %c0_7 = arith.constant 0 : index
    %c0_8 = arith.constant 0 : index
    %c0_9 = arith.constant 0 : index
    %5 = vector.load %arg9[%c0_7, %c0_8, %c0_9] : memref<2x10x80xf32, #tpu.memory_space<vmem>>, vector<2x8x80xf32>
    %6 = vector.shape_cast %5 : vector<2x8x80xf32> to vector<16x80xf32>
    %c0_10 = arith.constant 0 : index
    %c0_11 = arith.constant 0 : index
    %c0_12 = arith.constant 0 : index
    %7 = vector.load %arg2[%c0_10, %c0_11, %c0_12] : memref<3x80x256xf32, #tpu.memory_space<vmem>>, vector<1x80x256xf32>
    %8 = vector.shape_cast %7 : vector<1x80x256xf32> to vector<80x256xf32>
    %cst_13 = arith.constant dense<0.000000e+00> : vector<16x256xf32>
    %9 = tpu.matmul %6, %8, %cst_13 {dimension_numbers = #tpu.dot_dimension_numbers<[1], [0], [0], [1], [0, 0, 1, 1], [], []>} : vector<16x80xf32>, vector<80x256xf32>, vector<16x256xf32> -> vector<16x256xf32>
    %10 = arith.addf %4, %9 : vector<16x256xf32>
    %c0_14 = arith.constant 0 : index
    %c1_15 = arith.constant 1 : index
    %c0_16 = arith.constant 0 : index
    %11 = vector.load %arg9[%c0_14, %c1_15, %c0_16] : memref<2x10x80xf32, #tpu.memory_space<vmem>>, vector<2x8x80xf32>
    %12 = vector.shape_cast %11 : vector<2x8x80xf32> to vector<16x80xf32>
    %c1_17 = arith.constant 1 : index
    %c0_18 = arith.constant 0 : index
    %c0_19 = arith.constant 0 : index
    %13 = vector.load %arg2[%c1_17, %c0_18, %c0_19] : memref<3x80x256xf32, #tpu.memory_space<vmem>>, vector<1x80x256xf32>
    %14 = vector.shape_cast %13 : vector<1x80x256xf32> to vector<80x256xf32>
    %cst_20 = arith.constant dense<0.000000e+00> : vector<16x256xf32>
    %15 = tpu.matmul %12, %14, %cst_20 {dimension_numbers = #tpu.dot_dimension_numbers<[1], [0], [0], [1], [0, 0, 1, 1], [], []>} : vector<16x80xf32>, vector<80x256xf32>, vector<16x256xf32> -> vector<16x256xf32>
    %16 = arith.addf %10, %15 : vector<16x256xf32>
    %c0_21 = arith.constant 0 : index
    %c2 = arith.constant 2 : index
    %c0_22 = arith.constant 0 : index
    %17 = vector.load %arg9[%c0_21, %c2, %c0_22] : memref<2x10x80xf32, #tpu.memory_space<vmem>>, vector<2x8x80xf32>
    %18 = vector.shape_cast %17 : vector<2x8x80xf32> to vector<16x80xf32>
    %c2_23 = arith.constant 2 : index
    %c0_24 = arith.constant 0 : index
    %c0_25 = arith.constant 0 : index
    %19 = vector.load %arg2[%c2_23, %c0_24, %c0_25] : memref<3x80x256xf32, #tpu.memory_space<vmem>>, vector<1x80x256xf32>
    %20 = vector.shape_cast %19 : vector<1x80x256xf32> to vector<80x256xf32>
    %cst_26 = arith.constant dense<0.000000e+00> : vector<16x256xf32>
    %21 = tpu.matmul %18, %20, %cst_26 {dimension_numbers = #tpu.dot_dimension_numbers<[1], [0], [0], [1], [0, 0, 1, 1], [], []>} : vector<16x80xf32>, vector<80x256xf32>, vector<16x256xf32> -> vector<16x256xf32>
    %22 = arith.addf %16, %21 : vector<16x256xf32>
    %cst_27 = arith.constant 0.000000e+00 : f32
    %23 = vector.broadcast %cst_27 : f32 to vector<16x256xf32>
    %24 = arith.maximumf %22, %23 : vector<16x256xf32>
    %c0_28 = arith.constant 0 : index
    %c0_29 = arith.constant 0 : index
    %25 = vector.load %arg3[%c0_28, %c0_29] : memref<256x8xf32, #tpu.memory_space<vmem>>, vector<256x8xf32>
    %cst_30 = arith.constant dense<0.000000e+00> : vector<16x8xf32>
    %26 = tpu.matmul %24, %25, %cst_30 {dimension_numbers = #tpu.dot_dimension_numbers<[1], [0], [0], [1], [0, 0, 1, 1], [], []>} : vector<16x256xf32>, vector<256x8xf32>, vector<16x8xf32> -> vector<16x8xf32>
    %cst_31 = arith.constant dense<0.000000e+00> : vector<8xf32>
    %27 = vector.multi_reduction <add>, %26, %cst_31 [0] : vector<16x8xf32> to vector<8xf32>
    %28 = vector.shape_cast %27 : vector<8xf32> to vector<1x8xf32>
    %cst_32 = arith.constant 0.001953125 : f32
    %29 = vector.broadcast %cst_32 : f32 to vector<1x8xf32>
    %30 = arith.mulf %28, %29 : vector<1x8xf32>
    %31 = tpu.concatenate %30, %30, %30, %30, %30, %30, %30, %30, %30, %30, %30, %30, %30, %30, %30, %30, %30, %30, %30, %30, %30, %30, %30, %30, %30, %30, %30, %30, %30, %30, %30, %30 in 1 : vector<1x8xf32>, vector<1x8xf32>, vector<1x8xf32>, vector<1x8xf32>, vector<1x8xf32>, vector<1x8xf32>, vector<1x8xf32>, vector<1x8xf32>, vector<1x8xf32>, vector<1x8xf32>, vector<1x8xf32>, vector<1x8xf32>, vector<1x8xf32>, vector<1x8xf32>, vector<1x8xf32>, vector<1x8xf32>, vector<1x8xf32>, vector<1x8xf32>, vector<1x8xf32>, vector<1x8xf32>, vector<1x8xf32>, vector<1x8xf32>, vector<1x8xf32>, vector<1x8xf32>, vector<1x8xf32>, vector<1x8xf32>, vector<1x8xf32>, vector<1x8xf32>, vector<1x8xf32>, vector<1x8xf32>, vector<1x8xf32>, vector<1x8xf32> -> vector<1x256xf32>
    %32 = vector.broadcast %31 : vector<1x256xf32> to vector<16x256xf32>
    %33 = arith.subf %24, %32 : vector<16x256xf32>
    %34 = arith.mulf %33, %33 : vector<16x256xf32>
    %cst_33 = arith.constant dense<0.000000e+00> : vector<16x8xf32>
    %35 = tpu.matmul %34, %25, %cst_33 {dimension_numbers = #tpu.dot_dimension_numbers<[1], [0], [0], [1], [0, 0, 1, 1], [], []>} : vector<16x256xf32>, vector<256x8xf32>, vector<16x8xf32> -> vector<16x8xf32>
    %cst_34 = arith.constant dense<0.000000e+00> : vector<8xf32>
    %36 = vector.multi_reduction <add>, %35, %cst_34 [0] : vector<16x8xf32> to vector<8xf32>
    %37 = vector.shape_cast %36 : vector<8xf32> to vector<1x8xf32>
    %cst_35 = arith.constant 0.001953125 : f32
    %38 = vector.broadcast %cst_35 : f32 to vector<1x8xf32>
    %39 = arith.mulf %37, %38 : vector<1x8xf32>
    %c0_36 = arith.constant 0 : index
    %c0_37 = arith.constant 0 : index
    %40 = vector.load %arg4[%c0_36, %c0_37] : memref<1x256xf32, #tpu.memory_space<vmem>>, vector<1x256xf32>
    %cst_38 = arith.constant 9.99999974E-6 : f32
    %41 = vector.broadcast %cst_38 : f32 to vector<1x8xf32>
    %42 = arith.addf %39, %41 : vector<1x8xf32>
    %43 = math.rsqrt %42 : vector<1x8xf32>
    %44 = tpu.concatenate %43, %43, %43, %43, %43, %43, %43, %43, %43, %43, %43, %43, %43, %43, %43, %43, %43, %43, %43, %43, %43, %43, %43, %43, %43, %43, %43, %43, %43, %43, %43, %43 in 1 : vector<1x8xf32>, vector<1x8xf32>, vector<1x8xf32>, vector<1x8xf32>, vector<1x8xf32>, vector<1x8xf32>, vector<1x8xf32>, vector<1x8xf32>, vector<1x8xf32>, vector<1x8xf32>, vector<1x8xf32>, vector<1x8xf32>, vector<1x8xf32>, vector<1x8xf32>, vector<1x8xf32>, vector<1x8xf32>, vector<1x8xf32>, vector<1x8xf32>, vector<1x8xf32>, vector<1x8xf32>, vector<1x8xf32>, vector<1x8xf32>, vector<1x8xf32>, vector<1x8xf32>, vector<1x8xf32>, vector<1x8xf32>, vector<1x8xf32>, vector<1x8xf32>, vector<1x8xf32>, vector<1x8xf32>, vector<1x8xf32>, vector<1x8xf32> -> vector<1x256xf32>
    %45 = arith.mulf %40, %44 : vector<1x256xf32>
    %46 = vector.broadcast %45 : vector<1x256xf32> to vector<16x256xf32>
    %47 = arith.mulf %33, %46 : vector<16x256xf32>
    %c0_39 = arith.constant 0 : index
    %c0_40 = arith.constant 0 : index
    %48 = vector.load %arg5[%c0_39, %c0_40] : memref<1x256xf32, #tpu.memory_space<vmem>>, vector<1x256xf32>
    %49 = vector.broadcast %48 : vector<1x256xf32> to vector<16x256xf32>
    %50 = arith.addf %47, %49 : vector<16x256xf32>
    %c0_41 = arith.constant 0 : index
    %c0_42 = arith.constant 0 : index
    %51 = vector.load %arg6[%c0_41, %c0_42] : memref<16x256xf32, #tpu.memory_space<vmem>>, vector<16x256xf32>
    tpu.vector_store %arg6[%c0_41, %c0_42], %50 {strides = array<i32>} : memref<16x256xf32, #tpu.memory_space<vmem>>, vector<16x256xf32>,
    %c0_43 = arith.constant 0 : index
    %c0_44 = arith.constant 0 : index
    %52 = vector.load %arg7[%c0_43, %c0_44] : memref<1x8xf32, #tpu.memory_space<vmem>>, vector<1x8xf32>
    tpu.vector_store %arg7[%c0_43, %c0_44], %30 {strides = array<i32>} : memref<1x8xf32, #tpu.memory_space<vmem>>, vector<1x8xf32>,
    %c0_45 = arith.constant 0 : index
    %c0_46 = arith.constant 0 : index
    %53 = vector.load %arg8[%c0_45, %c0_46] : memref<1x8xf32, #tpu.memory_space<vmem>>, vector<1x8xf32>
    tpu.vector_store %arg8[%c0_45, %c0_46], %39 {strides = array<i32>} : memref<1x8xf32, #tpu.memory_space<vmem>>, vector<1x8xf32>,
    return
  }
  func.func @transform_0(%arg0: i32) -> (i32, i32, i32) {
    %c0_i32 = arith.constant 0 : i32
    %c0_i32_0 = arith.constant 0 : i32
    %c0_i32_1 = arith.constant 0 : i32
    %c0_i32_2 = arith.constant 0 : i32
    return %c0_i32, %c0_i32_0, %c0_i32_1 : i32, i32, i32
  }
  func.func @transform_1(%arg0: i32) -> (i32, i32, i32) {
    %c0_i32 = arith.constant 0 : i32
    %c0_i32_0 = arith.constant 0 : i32
    %c0_i32_1 = arith.constant 0 : i32
    %c0_i32_2 = arith.constant 0 : i32
    return %c0_i32, %c0_i32_0, %c0_i32_1 : i32, i32, i32
  }
  func.func @transform_2(%arg0: i32) -> (i32, i32) {
    %c0_i32 = arith.constant 0 : i32
    %c0_i32_0 = arith.constant 0 : i32
    %c0_i32_1 = arith.constant 0 : i32
    return %c0_i32, %c0_i32_0 : i32, i32
  }
  func.func @transform_3(%arg0: i32) -> (i32, i32) {
    %c0_i32 = arith.constant 0 : i32
    %c0_i32_0 = arith.constant 0 : i32
    %c0_i32_1 = arith.constant 0 : i32
    return %c0_i32, %c0_i32_0 : i32, i32
  }
  func.func @transform_4(%arg0: i32) -> (i32, i32) {
    %c0_i32 = arith.constant 0 : i32
    %c0_i32_0 = arith.constant 0 : i32
    %c0_i32_1 = arith.constant 0 : i32
    return %c0_i32, %c0_i32_0 : i32, i32
  }
  func.func @transform_5(%arg0: i32) -> (i32, i32) {
    %c0_i32 = arith.constant 0 : i32
    %c0_i32_0 = arith.constant 0 : i32
    %c0_i32_1 = arith.constant 0 : i32
    return %c0_i32, %c0_i32_0 : i32, i32
  }
  func.func @transform_6(%arg0: i32) -> (i32, i32) {
    %c0_i32 = arith.constant 0 : i32
    %c0_i32_0 = arith.constant 0 : i32
    %c0_i32_1 = arith.constant 0 : i32
    return %c0_i32, %c0_i32_0 : i32, i32
  }
  func.func @transform_7(%arg0: i32) -> (i32, i32) {
    %c0_i32 = arith.constant 0 : i32
    %c0_i32_0 = arith.constant 0 : i32
    %c0_i32_1 = arith.constant 0 : i32
    return %c0_i32, %c0_i32_0 : i32, i32
  }
}

</mosaic_0001>

<bundles_post_ra>
// kernel: decode_block_forward.1
= control target key start
LH: loop header
LB: loop body
LE: loop exit
PB: predicated region body
PF: predicated region fallthrough
CT: control target
= control target key end

     0   :  { %13 = vsyncpa [#allocation4], 0  ;;  %vm25_vm0 = vcmask 654336   ;;  %s997_s30 = smov 8   ;;  %vm27_vm1 = vcmask 648192   ;;  %v998_v9 = vmov 0.0   ;;  %s1510_s0 = inlined_call_operand.vmem [shape: f32[2,8,64], index: 0, kind: input, shape index: {}]   ;;  %s1511_s1 = inlined_call_operand.vmem [shape: f32[3,80,256], index: 1, kind: input, shape index: {}]   ;;  %s1512_s2 = inlined_call_operand.vmem [shape: f32[256,8], index: 2, kind: input, shape index: {}]   ;;  %s1513_s3 = inlined_call_operand.vmem [shape: f32[1,256], index: 3, kind: input, shape index: {}]   ;;  %s1514_s4 = inlined_call_operand.vmem [shape: f32[1,256], index: 4, kind: input, shape index: {}]   ;;  %s1515_s5 = inlined_call_operand.vmem [shape: f32[16,256], index: 5, kind: output, shape index: {0}]   ;;  %s1516_s6 = inlined_call_operand.hbm [shape: f32[1,8], index: 6, kind: output, shape index: {1}]   ;;  %s1517_s7 = inlined_call_operand.hbm [shape: f32[1,8], index: 7, kind: output, shape index: {2}]  }
   0x1   :  { %v31_v0 = vld [vmem:[%s1510_s0] sm:$0xff]  ;;  %v32_v1 = vld [vmem:[%s1510_s0 + $0x8] sm:$0xff]  ;;  %v829_v2 = vld [vmem:[%s1511_s1 + $0x138] sm:$0xff]  ;;  %26 = vst.msk [vmem:[#allocation2] sm:$0xff] %vm25_vm0, %v998_v9  ;;  %159 = vmatprep.mubr.f32.mxu0 %v998_v9  ;;  %242 = vmatprep.mubr.f32.mxu1 %v998_v9 }
   0x2   :  { %35 = vrot.lane.b32.xlu0 %v31_v0, %s997_s30  ;;  %107 = vmatprep.subr.mxu0 %v829_v2  ;;  %v828_v3 = vld [vmem:[%s1511_s1 + $0x130] sm:$0xff]  ;;  %v65_v4 = vld [vmem:[%s1511_s1 + $0x98] sm:$0xff]  ;;  %v827_v5 = vld [vmem:[%s1511_s1 + $0x128] sm:$0xff]  ;;  %28 = vst.msk [vmem:[#allocation2 + $0x8] sm:$0x3] %vm27_vm1, %v998_v9 }
   0x3   :  { %108 = vmatpush1.msra.mxu0 %v828_v3  ;;  %190 = vmatprep.subr.mxu1 %v65_v4  ;;  %v64_v6 = vld [vmem:[%s1511_s1 + $0x90] sm:$0xff]  ;;  %v826_v7 = vld [vmem:[%s1511_s1 + $0x120] sm:$0xff]  ;;  %v63_v8 = vld [vmem:[%s1511_s1 + $0x88] sm:$0xff]  ;;  %29 = vst.msk [vmem:[#allocation2 + $0x10] sm:$0xff] %vm25_vm0, %v998_v9 }
   0x4   :  { %30 = vst.msk [vmem:[#allocation2 + $0x18] sm:$0x3] %vm27_vm1, %v998_v9  ;;  %109 = vmatprep.subr.mxu0 %v827_v5  ;;  %191 = vmatpush1.msra.mxu1 %v64_v6  ;;  %v825_v10 = vld [vmem:[%s1511_s1 + $0x118] sm:$0xff]  ;;  %v62_v11 = vld [vmem:[%s1511_s1 + $0x80] sm:$0xff]  ;;  %v824_v12 = vld [vmem:[%s1511_s1 + $0x110] sm:$0xff] }
   0x5   :  { %110 = vmatpush1.msra.mxu0 %v826_v7  ;;  %192 = vmatprep.subr.mxu1 %v63_v8  ;;  %v61_v13 = vld [vmem:[%s1511_s1 + $0x78] sm:$0xff]  ;;  %v823_v14 = vld [vmem:[%s1511_s1 + $0x108] sm:$0xff]  ;;  %v60_v15 = vld [vmem:[%s1511_s1 + $0x70] sm:$0xff] }
   0x6   :  { %37 = vrot.lane.b32.xlu0 %v32_v1, %s997_s30  ;;  %111 = vmatprep.subr.mxu0 %v825_v10  ;;  %v822_v16 = vld [vmem:[%s1511_s1 + $0x100] sm:$0xff]  ;;  %v59_v17 = vld [vmem:[%s1511_s1 + $0x68] sm:$0xff]  ;;  %v821_v18 = vld [vmem:[%s1511_s1 + $0xf8] sm:$0xff] }
   0x7   :  { %193 = vmatpush1.msra.mxu1 %v62_v11  ;;  %112 = vmatpush1.msra.mxu0 %v824_v12  ;;  %v58_v19 = vld [vmem:[%s1511_s1 + $0x60] sm:$0xff]  ;;  %v820_v20 = vld [vmem:[%s1511_s1 + $0xf0] sm:$0xff]  ;;  %v57_v21 = vld [vmem:[%s1511_s1 + $0x58] sm:$0xff] }
   0x8   :  { %194 = vmatprep.subr.mxu1 %v61_v13  ;;  %113 = vmatprep.subr.mxu0 %v823_v14  ;;  %v819_v22 = vld [vmem:[%s1511_s1 + $0xe8] sm:$0xff]  ;;  %v56_v23 = vld [vmem:[%s1511_s1 + $0x50] sm:$0xff]  ;;  %v818_v24 = vld [vmem:[%s1511_s1 + $0xe0] sm:$0xff] }
   0x9   :  { %195 = vmatpush1.msra.mxu1 %v60_v15  ;;  %114 = vmatpush1.msra.mxu0 %v822_v16  ;;  %v55_v25 = vld [vmem:[%s1511_s1 + $0x48] sm:$0xff]  ;;  %v817_v26 = vld [vmem:[%s1511_s1 + $0xd8] sm:$0xff]  ;;  %v54_v27 = vld [vmem:[%s1511_s1 + $0x40] sm:$0xff] }
   0xa   :  { %196 = vmatprep.subr.mxu1 %v59_v17  ;;  %115 = vmatprep.subr.mxu0 %v821_v18  ;;  %v816_v28 = vld [vmem:[%s1511_s1 + $0xd0] sm:$0xff]  ;;  %v53_v29 = vld [vmem:[%s1511_s1 + $0x38] sm:$0xff]  ;;  %v815_v30 = vld [vmem:[%s1511_s1 + $0xc8] sm:$0xff] }
   0xb   :  { %197 = vmatpush1.msra.mxu1 %v58_v19  ;;  %116 = vmatpush1.msra.mxu0 %v820_v20  ;;  %v52_v31 = vld [vmem:[%s1511_s1 + $0x30] sm:$0xff]  ;;  %v814_v32 = vld [vmem:[%s1511_s1 + $0xc0] sm:$0xff]  ;;  %v51_v33 = vld [vmem:[%s1511_s1 + $0x28] sm:$0xff] }
   0xc   :  { %198 = vmatprep.subr.mxu1 %v57_v21  ;;  %117 = vmatprep.subr.mxu0 %v819_v22  ;;  %v813_v34 = vld [vmem:[%s1511_s1 + $0xb8] sm:$0xff]  ;;  %v50_v35 = vld [vmem:[%s1511_s1 + $0x20] sm:$0xff]  ;;  %v812_v36 = vld [vmem:[%s1511_s1 + $0xb0] sm:$0xff] }
   0xd   :  { %199 = vmatpush1.msra.mxu1 %v56_v23  ;;  %118 = vmatpush1.msra.mxu0 %v818_v24  ;;  %v49_v37 = vld [vmem:[%s1511_s1 + $0x18] sm:$0xff]  ;;  %v811_v38 = vld [vmem:[%s1511_s1 + $0xa8] sm:$0xff]  ;;  %v48_v39 = vld [vmem:[%s1511_s1 + $0x10] sm:$0xff] }
   0xe   :  { %200 = vmatprep.subr.mxu1 %v55_v25  ;;  %119 = vmatprep.subr.mxu0 %v817_v26  ;;  %v810_v40 = vld [vmem:[%s1511_s1 + $0xa0] sm:$0xff]  ;;  %v47_v41 = vld [vmem:[%s1511_s1 + $0x8] sm:$0xff]  ;;  %v853_v43 = vld [vmem:[%s1511_s1 + $0x1d8] sm:$0xff] }
   0xf   :  { %201 = vmatpush1.msra.mxu1 %v54_v27  ;;  %120 = vmatpush1.msra.mxu0 %v816_v28  ;;  %v46_v42 = vld [vmem:[%s1511_s1] sm:$0xff]  ;;  %v1196_v44 = vld [vmem:[%s1512_s2 + $0xf8] sm:$0xff] }
  0x10   :  { %202 = vmatprep.subr.mxu1 %v53_v29  ;;  %121 = vmatprep.subr.mxu0 %v815_v30 }
  0x11   :  { %203 = vmatpush1.msra.mxu1 %v52_v31  ;;  %122 = vmatpush1.msra.mxu0 %v814_v32 }
  0x12   :  { %204 = vmatprep.subr.mxu1 %v51_v33  ;;  %123 = vmatprep.subr.mxu0 %v813_v34 }
  0x13   :  { %205 = vmatpush1.msra.mxu1 %v50_v35  ;;  %124 = vmatpush1.msra.mxu0 %v812_v36 }
  0x14   :  { %206 = vmatprep.subr.mxu1 %v49_v37  ;;  %125 = vmatprep.subr.mxu0 %v811_v38 }
  0x15   :  { %207 = vmatpush1.msra.mxu1 %v48_v39  ;;  %126 = vmatpush1.msra.mxu0 %v810_v40 }
  0x16   :  { %208 = vmatprep.subr.mxu1 %v47_v41 }
  0x17   :  { %209 = vmatpush1.msra.mxu1 %v46_v42 }
  0x18   :  { %14 = vsyncpa [#allocation6], 0  ;;  %296 = vmatprep.subr.mxu0 %v853_v43  ;;  %856 = vmatprep.subr.mxu1 %v1196_v44  ;;  %vm41_vm2 = vcmask 588864   ;;  %v852_v47 = vld [vmem:[%s1511_s1 + $0x1d0] sm:$0xff]  ;;  %v851_v50 = vld [vmem:[%s1511_s1 + $0x1c8] sm:$0xff]  ;;  %vm476_vm3 = vcmask 64512  }
  0x19   :  { %v850_v51 = vld [vmem:[%s1511_s1 + $0x1c0] sm:$0xff]  ;;  %v384_v52 = vld [vmem:[%s1512_s2 + $0x78] sm:$0xff]  ;;  %v848_v54 = vld [vmem:[%s1511_s1 + $0x1b0] sm:$0xff]  ;;  %vm775_vm4 = vcmask 57344   ;;  %s1000_s25 = smov 40   ;;  %s1001_s26 = smov 16  }
  0x1a   :  { %v849_v53 = vld [vmem:[%s1511_s1 + $0x1b8] sm:$0xff]  ;;  %v847_v55 = vld [vmem:[%s1511_s1 + $0x1a8] sm:$0xff]  ;;  %v846_v58 = vld [vmem:[%s1511_s1 + $0x1a0] sm:$0xff]  ;;  %s1002_s27 = smov 56   ;;  %s1003_s28 = smov 32   ;;  %vm534_vm5 = vcmask 130048  }
  0x1b   :  { %v399_v59 = vld [vmem:[%s1512_s2 + $0xf0] sm:$0xff]  ;;  %v845_v60 = vld [vmem:[%s1511_s1 + $0x198] sm:$0xff]  ;;  %v398_v63 = vld [vmem:[%s1512_s2 + $0xe8] sm:$0xff]  ;;  %s1004_s29 = smov 72   ;;  %s1005_s8 = smov 48   ;;  %vm536_vm6 = vcmask 195584  }
  0x1c   :  { %v383_v61 = vld [vmem:[%s1512_s2 + $0x70] sm:$0xff]  ;;  %v843_v0 = vld [vmem:[%s1511_s1 + $0x188] sm:$0xff]  ;;  %v842_v1 = vld [vmem:[%s1511_s1 + $0x180] sm:$0xff]  ;;  %s1006_s9 = smov 88   ;;  %s1007_s10 = smov 64   ;;  %vm538_vm7 = vcmask 261120  }
  0x1d   :  { %v844_v62 = vld [vmem:[%s1511_s1 + $0x190] sm:$0xff]  ;;  %v841_v2 = vld [vmem:[%s1511_s1 + $0x178] sm:$0xff]  ;;  %v839_v4 = vld [vmem:[%s1511_s1 + $0x168] sm:$0xff]  ;;  %s1008_s11 = smov 104   ;;  %s1009_s12 = smov 80   ;;  %vm540_vm8 = vcmask 326656  }
  0x1e   :  { %v840_v3 = vld [vmem:[%s1511_s1 + $0x170] sm:$0xff]  ;;  %v838_v5 = vld [vmem:[%s1511_s1 + $0x160] sm:$0xff]  ;;  %v837_v6 = vld [vmem:[%s1511_s1 + $0x158] sm:$0xff]  ;;  %s1010_s13 = smov 120   ;;  %s1011_s0 = smov 96   ;;  %vm542_vm9 = vcmask 392192  }
  0x1f   :  { %v836_v7 = vld [vmem:[%s1511_s1 + $0x150] sm:$0xff]  ;;  %v835_v8 = vld [vmem:[%s1511_s1 + $0x148] sm:$0xff]  ;;  %v834_v10 = vld [vmem:[%s1511_s1 + $0x140] sm:$0xff]  ;;  %s1012_s14 = smov 112   ;;  %vm544_vm10 = vcmask 457728   ;;  %vm546_vm11 = vcmask 523264  }
  0x20   :  { %v382_v13 = vld [vmem:[%s1512_s2 + $0x68] sm:$0xff]  ;;  %v397_v14 = vld [vmem:[%s1512_s2 + $0xe0] sm:$0xff]  ;;  %v396_v15 = vld [vmem:[%s1512_s2 + $0xd8] sm:$0xff]  ;;  %vm548_vm12 = vcmask 588800   ;;  %vm551_vm13 = vcmask 719872   ;;  %vm553_vm14 = vcmask 785408  }
  0x21   :  { %v380_v16 = vld [vmem:[%s1512_s2 + $0x58] sm:$0xff]  ;;  %v395_v17 = vld [vmem:[%s1512_s2 + $0xd0] sm:$0xff]  ;;  %v394_v19 = vld [vmem:[%s1512_s2 + $0xc8] sm:$0xff]  ;;  %vm555_vm15 = vcmask 850944   ;;  %vm557_vm1 = vcmask 916480   ;;  %s1014_s16 = smov [#allocation5]  }
  0x22   :  { %v379_v18 = vld [vmem:[%s1512_s2 + $0x50] sm:$0xff]  ;;  %v378_v20 = vld [vmem:[%s1512_s2 + $0x48] sm:$0xff]  ;;  %v393_v21 = vld [vmem:[%s1512_s2 + $0xc0] sm:$0xff]  ;;  %s796_s17 = sshll.u32 %s1014_s16, 4  ;;  %s797_s17 = int_to_ptr.vmem [resolvable:$true] %s796_s17 }
  0x23   :  { %v377_v22 = vld [vmem:[%s1512_s2 + $0x40] sm:$0xff]  ;;  %v392_v23 = vld [vmem:[%s1512_s2 + $0xb8] sm:$0xff]  ;;  %v391_v25 = vld [vmem:[%s1512_s2 + $0xb0] sm:$0xff] }
  0x24   :  { %v376_v24 = vld [vmem:[%s1512_s2 + $0x38] sm:$0xff]  ;;  %v375_v26 = vld [vmem:[%s1512_s2 + $0x30] sm:$0xff]  ;;  %v390_v27 = vld [vmem:[%s1512_s2 + $0xa8] sm:$0xff] }
  0x25   :  { %v374_v28 = vld [vmem:[%s1512_s2 + $0x28] sm:$0xff]  ;;  %v389_v29 = vld [vmem:[%s1512_s2 + $0xa0] sm:$0xff]  ;;  %v388_v31 = vld [vmem:[%s1512_s2 + $0x98] sm:$0xff] }
  0x26   :  { %v373_v30 = vld [vmem:[%s1512_s2 + $0x20] sm:$0xff]  ;;  %v372_v32 = vld [vmem:[%s1512_s2 + $0x18] sm:$0xff]  ;;  %v387_v33 = vld [vmem:[%s1512_s2 + $0x90] sm:$0xff] }
  0x27   :  { %v371_v34 = vld [vmem:[%s1512_s2 + $0x10] sm:$0xff]  ;;  %v386_v35 = vld [vmem:[%s1512_s2 + $0x88] sm:$0xff]  ;;  %v385_v37 = vld [vmem:[%s1512_s2 + $0x80] sm:$0xff] }
  0x28   :  { %v370_v36 = vld [vmem:[%s1512_s2 + $0x8] sm:$0xff]  ;;  %v369_v38 = vld [vmem:[%s1512_s2] sm:$0xff] }
  0x74   :  { %v36_v45 = vpop.permute.xlu0 %35 }
  0x75   :  { %42 = vst.msk [vmem:[#allocation2 + $0x1] sm:$0xff] %vm41_vm2, %v36_v45 }
  0x78   :  { %v38_v46 = vpop.permute.xlu0 %37 }
  0x79   :  { %43 = vst.msk [vmem:[#allocation2 + $0x11] sm:$0xff] %vm41_vm2, %v38_v46  ;;  %vm559_vm2 = vcmask 982016  }
  0x7c   :  { %v66_v48 = vld [vmem:[#allocation2 + $0x1] sm:$0xff] }
  0x7d   :  { %v44_v49 = vld [vmem:[#allocation2] sm:$0xff]  ;;  %830 = vmatmul.mubr.msk.f32.vlgmr.msra.gmra.mxu0 %vm25_vm0, %v66_v48 }
  0x7e   :  { %832 = vmatmul.mubr.msk.f32.vlgmr.msra.gmra.mxu1 %vm25_vm0, %v44_v49  ;;  %297 = vmatpush1.msra.mxu0 %v852_v47  ;;  %v255_v11 = vld [vmem:[#allocation2 + $0x2] sm:$0xff] }
  0x7f   :  { %165 = vmatprep.mubr.f32.mxu0 %v998_v9  ;;  %298 = vmatprep.subr.mxu0 %v851_v50 }
  0x80   :  { %248 = vmatprep.mubr.f32.mxu1 %v998_v9  ;;  %299 = vmatpush1.msra.mxu0 %v850_v51  ;;  %v67_v56 = vld [vmem:[#allocation2 + $0x11] sm:$0xff] }
  0x81   :  { %v45_v57 = vld [vmem:[#allocation2 + $0x10] sm:$0xff]  ;;  %857 = vmatpush3.msra.mxu1 %v384_v52  ;;  %300 = vmatprep.subr.mxu0 %v849_v53 }
  0x82   :  { %831 = vmatmul.mubr.msk.f32.gmra.mxu0 %vm25_vm0, %v67_v56  ;;  %833 = vmatmul.mubr.msk.f32.gmra.mxu1 %vm25_vm0, %v45_v57  ;;  %v256_v12 = vld [vmem:[#allocation2 + $0x12] sm:$0xff] }
  0x83   :  { %301 = vmatpush1.msra.mxu0 %v848_v54  ;;  %348 = vmatprep.mubr.f32.mxu0 %v998_v9 }
  0x84   :  { %302 = vmatprep.subr.mxu0 %v847_v55  ;;  %858 = vmatprep.subr.mxu1 %v399_v59 }
  0x85   :  { %303 = vmatpush1.msra.mxu0 %v846_v58  ;;  %859 = vmatpush3.msra.mxu1 %v383_v61 }
  0x86   :  { %304 = vmatprep.subr.mxu0 %v845_v60  ;;  %860 = vmatprep.subr.mxu1 %v398_v63 }
  0x87   :  { %305 = vmatpush1.msra.mxu0 %v844_v62  ;;  %861 = vmatpush3.msra.mxu1 %v382_v13 }
  0x88   :  { %306 = vmatprep.subr.mxu0 %v843_v0  ;;  %862 = vmatprep.subr.mxu1 %v397_v14 }
  0x89   :  { %307 = vmatpush1.msra.mxu0 %v842_v1 }
  0x8a   :  { %308 = vmatprep.subr.mxu0 %v841_v2 }
  0x8b   :  { %309 = vmatpush1.msra.mxu0 %v840_v3 }
  0x8c   :  { %310 = vmatprep.subr.mxu0 %v839_v4 }
  0x8d   :  { %311 = vmatpush1.msra.mxu0 %v838_v5 }
  0x8e   :  { %312 = vmatprep.subr.mxu0 %v837_v6 }
  0x8f   :  { %313 = vmatpush1.msra.mxu0 %v836_v7 }
  0x90   :  { %314 = vmatprep.subr.mxu0 %v835_v8 }
  0x91   :  { %315 = vmatpush1.msra.mxu0 %v834_v10 }
  0x92   :  { %854 = vmatmul.mubr.msk.f32.vlgmr.msra.gmra.mxu0 %vm25_vm0, %v255_v11  ;;  %894 = vmatprep.subr.mxu0 %v1196_v44 }
  0x93   :  { %354 = vmatprep.mubr.f32.mxu0 %v998_v9  ;;  %895 = vmatpush3.msra.mxu0 %v384_v52  ;;  %v381_v9 = vld [vmem:[%s1512_s2 + $0x60] sm:$0xff]  ;;  %s999_s2 = smov 24  }
  0x94   :  { %896 = vmatprep.subr.mxu0 %v399_v59  ;;  %863 = vmatpush3.msra.mxu1 %v381_v9 }
  0x95   :  { %897 = vmatpush3.msra.mxu0 %v383_v61  ;;  %864 = vmatprep.subr.mxu1 %v396_v15 }
  0x96   :  { %855 = vmatmul.mubr.msk.f32.gmra.mxu0 %vm25_vm0, %v256_v12  ;;  %898 = vmatprep.subr.mxu0 %v398_v63 }
  0x97   :  { %899 = vmatpush3.msra.mxu0 %v382_v13  ;;  %865 = vmatpush3.msra.mxu1 %v380_v16 }
  0x98   :  { %900 = vmatprep.subr.mxu0 %v397_v14  ;;  %866 = vmatprep.subr.mxu1 %v395_v17 }
  0x99   :  { %901 = vmatpush3.msra.mxu0 %v381_v9  ;;  %867 = vmatpush3.msra.mxu1 %v379_v18 }
  0x9a   :  { %902 = vmatprep.subr.mxu0 %v396_v15  ;;  %868 = vmatprep.subr.mxu1 %v394_v19 }
  0x9b   :  { %903 = vmatpush3.msra.mxu0 %v380_v16  ;;  %869 = vmatpush3.msra.mxu1 %v378_v20 }
  0x9c   :  { %904 = vmatprep.subr.mxu0 %v395_v17  ;;  %870 = vmatprep.subr.mxu1 %v393_v21 }
  0x9d   :  { %905 = vmatpush3.msra.mxu0 %v379_v18  ;;  %871 = vmatpush3.msra.mxu1 %v377_v22 }
  0x9e   :  { %906 = vmatprep.subr.mxu0 %v394_v19  ;;  %872 = vmatprep.subr.mxu1 %v392_v23 }
  0x9f   :  { %907 = vmatpush3.msra.mxu0 %v378_v20  ;;  %873 = vmatpush3.msra.mxu1 %v376_v24 }
  0xa0   :  { %908 = vmatprep.subr.mxu0 %v393_v21  ;;  %874 = vmatprep.subr.mxu1 %v391_v25 }
  0xa1   :  { %909 = vmatpush3.msra.mxu0 %v377_v22  ;;  %875 = vmatpush3.msra.mxu1 %v375_v26 }
  0xa2   :  { %910 = vmatprep.subr.mxu0 %v392_v23  ;;  %876 = vmatprep.subr.mxu1 %v390_v27 }
  0xa3   :  { %911 = vmatpush3.msra.mxu0 %v376_v24  ;;  %877 = vmatpush3.msra.mxu1 %v374_v28 }
  0xa4   :  { %912 = vmatprep.subr.mxu0 %v391_v25  ;;  %878 = vmatprep.subr.mxu1 %v389_v29 }
  0xa5   :  { %913 = vmatpush3.msra.mxu0 %v375_v26  ;;  %879 = vmatpush3.msra.mxu1 %v373_v30 }
  0xa6   :  { %914 = vmatprep.subr.mxu0 %v390_v27  ;;  %880 = vmatprep.subr.mxu1 %v388_v31 }
  0xa7   :  { %915 = vmatpush3.msra.mxu0 %v374_v28  ;;  %881 = vmatpush3.msra.mxu1 %v372_v32 }
  0xa8   :  { %916 = vmatprep.subr.mxu0 %v389_v29  ;;  %882 = vmatprep.subr.mxu1 %v387_v33 }
  0xa9   :  { %917 = vmatpush3.msra.mxu0 %v373_v30  ;;  %883 = vmatpush3.msra.mxu1 %v371_v34 }
  0xaa   :  { %918 = vmatprep.subr.mxu0 %v388_v31  ;;  %884 = vmatprep.subr.mxu1 %v386_v35 }
  0xab   :  { %919 = vmatpush3.msra.mxu0 %v372_v32  ;;  %885 = vmatpush3.msra.mxu1 %v370_v36 }
  0xac   :  { %920 = vmatprep.subr.mxu0 %v387_v33  ;;  %886 = vmatprep.subr.mxu1 %v385_v37  ;;  %v561_v33 = vlaneseq }
  0xad   :  { %921 = vmatpush3.msra.mxu0 %v371_v34  ;;  %887 = vmatpush3.msra.mxu1 %v369_v38 }
  0xae   :  { %922 = vmatprep.subr.mxu0 %v386_v35 }
  0xaf   :  { %923 = vmatpush3.msra.mxu0 %v370_v36 }
  0xb0   :  { %924 = vmatprep.subr.mxu0 %v385_v37 }
  0xb1   :  { %925 = vmatpush3.msra.mxu0 %v369_v38  ;;  %v1410_v38 = vshrl.u32 %v561_v33, 7 }
 0x13d   :  { %v161_v39 = vpop.f32.mrf.mxu0 }
 0x13e   :  { %v244_v40 = vpop.f32.mrf.mxu1 }
 0x13f   :  { %v163_v41 = vpop.f32.mrf.mxu0  ;;  %v245_v46 = vadd.f32 %v244_v40, %v161_v39 }
 0x140   :  { %v246_v43 = vpop.f32.mrf.mxu1 }
 0x141   :  { %v247_v48 = vadd.f32 %v246_v43, %v163_v41 }
 0x142   :  { %v167_v42 = vpop.f32.mrf.mxu0  ;;  %v250_v44 = vpop.f32.mrf.mxu1 }
 0x143   :  { %v251_v53 = vadd.f32 %v250_v44, %v167_v42  ;;  %v1415_v42 = vsub.s32 0, %v1410_v38 }
 0x144   :  { %v169_v45 = vpop.f32.mrf.mxu0  ;;  %v252_v49 = vpop.f32.mrf.mxu1 }
 0x145   :  { %v253_v55 = vadd.f32 %v252_v49, %v169_v45 }
 0x152   :  { %v350_v47 = vpop.f32.mrf.mxu0 }
 0x153   :  { %v1362_v50 = vadd.f32 %v350_v47, %v245_v46 }
 0x154   :  { %v352_v51 = vpop.f32.mrf.mxu0 }
 0x155   :  { %v1364_v52 = vadd.f32 %v352_v51, %v247_v48  ;;  %v365_v57 = vmax.f32 %v1362_v50, 0.0 }
 0x156   :  { %v356_v54 = vpop.f32.mrf.mxu0 }
 0x157   :  { %v366_v56 = vmax.f32 %v1364_v52, 0.0  ;;  %v1368_v58 = vadd.f32 %v356_v54, %v251_v53 }
 0x158   :  { %v358_v59 = vpop.f32.mrf.mxu0 }
 0x159   :  { %v1370_v60 = vadd.f32 %v358_v59, %v253_v55  ;;  %465 = vmatprep.mubr.f32.mxu1 %v366_v56  ;;  %v367_v62 = vmax.f32 %v1368_v58, 0.0 }
 0x15a   :  { %466 = vmatmul.mubr.f32.vlgmr.msra.gmra.mxu1 %v365_v57 }
 0x15b   :  { %v368_v61 = vmax.f32 %v1370_v60, 0.0 }
 0x15d   :  { %470 = vmatprep.mubr.f32.mxu1 %v368_v61 }
 0x15e   :  { %471 = vmatmul.mubr.f32.gmra.mxu1 %v367_v62 }
 0x21a   :  { %v888_v63 = vpop.f32.mrf.mxu1 }
 0x21c   :  { %v889_v0 = vpop.f32.mrf.mxu1 }
 0x21d   :  { %v890_v2 = vadd.f32 %v889_v0, %v888_v63 }
 0x21e   :  { %v891_v1 = vpop.f32.mrf.mxu1 }
 0x21f   :  { %v477_v5 = vsel %vm476_vm3, %v890_v2, 0.0 }
 0x220   :  { %v892_v3 = vpop.f32.mrf.mxu1 }
 0x221   :  { %v893_v4 = vadd.f32 %v892_v3, %v891_v1 }
 0x223   :  { %v478_v6 = vsel %vm476_vm3, %v893_v4, 0.0 }
 0x224   :  { %v479_v7 = vadd.f32 %v478_v6, %v477_v5 }
 0x226   :  { %v480_v8 = vrot.slane %v479_v7, 4 }
 0x228   :  { %v481_v10 = vadd.f32 %v480_v8, %v479_v7 }
 0x22a   :  { %v482_v11 = vrot.slane %v481_v10, 2 }
 0x22c   :  { %v483_v12 = vadd.f32 %v482_v11, %v481_v10 }
 0x22e   :  { %v484_v13 = vrot.slane %v483_v12, 1 }
 0x230   :  { %v485_v14 = vadd.f32 %v484_v13, %v483_v12 }
 0x232   :  { %v486_v9 = vmul.f32 0.001953125, %v485_v14 }
 0x234   :  { %494 = vrot.lane.b32.xlu0 %v486_v9, %s999_s2  ;;  %488 = vrot.lane.b32.xlu1 %v486_v9, %s997_s30  ;;  %776 = vst.msk [vmem:[#allocation3] sm:$0x1] %vm775_vm4, %v486_v9 }
 0x238   :  { %500 = vrot.lane.b32.xlu0 %v486_v9, %s1000_s25  ;;  %491 = vrot.lane.b32.xlu1 %v486_v9, %s1001_s26 }
 0x23c   :  { %506 = vrot.lane.b32.xlu0 %v486_v9, %s1002_s27  ;;  %497 = vrot.lane.b32.xlu1 %v486_v9, %s1003_s28 }
 0x240   :  { %512 = vrot.lane.b32.xlu0 %v486_v9, %s1004_s29  ;;  %503 = vrot.lane.b32.xlu1 %v486_v9, %s1005_s8 }
 0x244   :  { %518 = vrot.lane.b32.xlu0 %v486_v9, %s1006_s9  ;;  %509 = vrot.lane.b32.xlu1 %v486_v9, %s1007_s10 }
 0x248   :  { %524 = vrot.lane.b32.xlu0 %v486_v9, %s1008_s11  ;;  %515 = vrot.lane.b32.xlu1 %v486_v9, %s1009_s12 }
 0x24c   :  { %530 = vrot.lane.b32.xlu0 %v486_v9, %s1010_s13  ;;  %521 = vrot.lane.b32.xlu1 %v486_v9, %s1011_s0 }
 0x250   :  { %527 = vrot.lane.b32.xlu1 %v486_v9, %s1012_s14 }
 0x2a6   :  { %v495_v15 = vpop.permute.xlu0 %494  ;;  %v489_v16 = vpop.permute.xlu1 %488 }
 0x2a7   :  { %v533_v17 = vsel %vm476_vm3, %v486_v9, %v489_v16 }
 0x2aa   :  { %v501_v18 = vpop.permute.xlu0 %500  ;;  %v492_v19 = vpop.permute.xlu1 %491 }
 0x2ab   :  { %v535_v20 = vsel %vm534_vm5, %v533_v17, %v492_v19 }
 0x2ac   :  { %v537_v22 = vsel %vm536_vm6, %v535_v20, %v495_v15 }
 0x2ae   :  { %v507_v21 = vpop.permute.xlu0 %506  ;;  %v498_v23 = vpop.permute.xlu1 %497 }
 0x2af   :  { %v539_v24 = vsel %vm538_vm7, %v537_v22, %v498_v23 }
 0x2b0   :  { %v541_v26 = vsel %vm540_vm8, %v539_v24, %v501_v18 }
 0x2b2   :  { %v513_v25 = vpop.permute.xlu0 %512  ;;  %v504_v27 = vpop.permute.xlu1 %503 }
 0x2b3   :  { %v543_v28 = vsel %vm542_vm9, %v541_v26, %v504_v27 }
 0x2b4   :  { %v545_v29 = vsel %vm544_vm10, %v543_v28, %v507_v21 }
 0x2b6   :  { %v510_v30 = vpop.permute.xlu1 %509  ;;  %v519_v31 = vpop.permute.xlu0 %518 }
 0x2b7   :  { %v547_v32 = vsel %vm546_vm11, %v545_v29, %v510_v30 }
 0x2b8   :  { %v549_v34 = vsel %vm548_vm12, %v547_v32, %v513_v25 }
 0x2ba   :  { %v516_v35 = vpop.permute.xlu1 %515  ;;  %v525_v37 = vpop.permute.xlu0 %524 }
 0x2bb   :  { %v550_v36 = vsel %vm25_vm0, %v549_v34, %v516_v35 }
 0x2bc   :  { %v552_v39 = vsel %vm551_vm13, %v550_v36, %v519_v31 }
 0x2be   :  { %v522_v40 = vpop.permute.xlu1 %521  ;;  %v531_v45 = vpop.permute.xlu0 %530 }
 0x2bf   :  { %v554_v41 = vsel %vm553_vm14, %v552_v39, %v522_v40 }
 0x2c0   :  { %v556_v43 = vsel %vm555_vm15, %v554_v41, %v525_v37 }
 0x2c2   :  { %v528_v44 = vpop.permute.xlu1 %527 }
 0x2c3   :  { %v558_v46 = vsel %vm557_vm1, %v556_v43, %v528_v44 }
 0x2c4   :  { %v560_v47 = vsel %vm559_vm2, %v558_v46, %v531_v45 }
 0x2c5   :  { %v564_v48 = vrot.slane %v560_v47, %v1415_v42 }
 0x2c7   :  { %v1423_v49 = vsub.f32 %v365_v57, %v564_v48  ;;  %v1427_v51 = vsub.f32 %v366_v56, %v564_v48  ;;  %v1431_v53 = vsub.f32 %v368_v61, %v564_v48  ;;  %v1439_v59 = vsub.f32 %v367_v62, %v564_v48 }
 0x2c9   :  { %v570_v54 = vmul.f32 %v1427_v51, %v1427_v51  ;;  %v569_v55 = vmul.f32 %v1423_v49, %v1423_v49  ;;  %v572_v50 = vmul.f32 %v1431_v53, %v1431_v53  ;;  %v571_v52 = vmul.f32 %v1439_v59, %v1439_v59 }
 0x2cb   :  { %637 = vmatprep.mubr.f32.mxu0 %v570_v54 }
 0x2cc   :  { %638 = vmatmul.mubr.f32.vlgmr.msra.gmra.mxu0 %v569_v55 }
 0x2cd   :  { %642 = vmatprep.mubr.f32.mxu0 %v572_v50 }
 0x2d0   :  { %643 = vmatmul.mubr.f32.gmra.mxu0 %v571_v52 }
 0x38c   :  { %v926_v56 = vpop.f32.mrf.mxu0 }
 0x38e   :  { %v927_v57 = vpop.f32.mrf.mxu0 }
 0x38f   :  { %v928_v61 = vadd.f32 %v927_v57, %v926_v56 }
 0x390   :  { %v929_v60 = vpop.f32.mrf.mxu0 }
 0x391   :  { %v648_v58 = vsel %vm476_vm3, %v928_v61, 0.0 }
 0x392   :  { %v930_v63 = vpop.f32.mrf.mxu0 }
 0x393   :  { %v931_v0 = vadd.f32 %v930_v63, %v929_v60 }
 0x395   :  { %v649_v62 = vsel %vm476_vm3, %v931_v0, 0.0 }
 0x396   :  { %v650_v1 = vadd.f32 %v649_v62, %v648_v58 }
 0x398   :  { %v651_v2 = vrot.slane %v650_v1, 4 }
 0x39a   :  { %v652_v3 = vadd.f32 %v651_v2, %v650_v1 }
 0x39c   :  { %v653_v4 = vrot.slane %v652_v3, 2 }
 0x39e   :  { %v654_v5 = vadd.f32 %v653_v4, %v652_v3 }
 0x3a0   :  { %v655_v6 = vrot.slane %v654_v5, 1 }
 0x3a2   :  { %v656_v7 = vadd.f32 %v655_v6, %v654_v5 }
 0x3a4   :  { %v657_v8 = vmul.f32 0.001953125, %v656_v7 }
 0x3a6   :  { %v659_v10 = vadd.f32 1e-05, %v657_v8  ;;  %777 = vst.msk [vmem:[#allocation5] sm:$0x1] %vm775_vm4, %v657_v8 }
 0x3a8   :  { %951 = vrsqrt.f32 %v659_v10 }
 0x3b5   :  { %v952_v11 = vpop.eup %951 }
 0x3b6   :  { %665 = vrot.lane.b32.xlu0 %v952_v11, %s1001_s26  ;;  %662 = vrot.lane.b32.xlu1 %v952_v11, %s997_s30  ;;  %s1013_s30 = smov [#allocation3]  }
 0x3b7   :  { %s786_s15 = sshll.u32 %s1013_s30, 4  ;;  %s787_s15 = int_to_ptr.vmem [resolvable:$true] %s786_s15 }
 0x3b8   :  { %s953_s18 = scalar_lea.vmem %s787_s15, 16  ;;  %s957_s19 = scalar_lea.vmem %s787_s15, 32 }
 0x3b9   :  { %p954_p0 = scmp.ne.s32.totalorder %s787_s15, %s953_s18  ;;  %p958_p1 = scmp.lt.s32.totalorder %s787_s15, %s787_s15 }
 0x3ba   :  { %671 = vrot.lane.b32.xlu0 %v952_v11, %s1003_s28  ;;  %668 = vrot.lane.b32.xlu1 %v952_v11, %s999_s2  ;;  %p959_p2 = scmp.lt.s32.totalorder %s957_s19, %s953_s18 }
 0x3bc   :  { %p960_p3 = por %p959_p2, %p958_p1 }
 0x3be   :  { %677 = vrot.lane.b32.xlu0 %v952_v11, %s1005_s8  ;;  %674 = vrot.lane.b32.xlu1 %v952_v11, %s1000_s25  ;;  %p961_p4 = pnand %p960_p3, %p954_p0 }
 0x3c2   :  { %683 = vrot.lane.b32.xlu0 %v952_v11, %s1007_s10  ;;  %680 = vrot.lane.b32.xlu1 %v952_v11, %s1002_s27 }
 0x3c6   :  { %689 = vrot.lane.b32.xlu0 %v952_v11, %s1009_s12  ;;  %686 = vrot.lane.b32.xlu1 %v952_v11, %s1004_s29 }
 0x3ca   :  { %695 = vrot.lane.b32.xlu0 %v952_v11, %s1011_s0  ;;  %692 = vrot.lane.b32.xlu1 %v952_v11, %s1006_s9 }
 0x3ce   :  { %701 = vrot.lane.b32.xlu0 %v952_v11, %s1012_s14  ;;  %698 = vrot.lane.b32.xlu1 %v952_v11, %s1008_s11 }
 0x3d2   :  { %704 = vrot.lane.b32.xlu1 %v952_v11, %s1010_s13 }
 0x3d3   :  { %964 = shalt.err (!%p961_p4)
}
 0x3d4   :  { %789 = dma.vmem_to_hbm [thread:$0]  %s787_s15, 16, %s1516_s6, [#allocation4]  }
 0x3d5   :  { %s973_s1 = scalar_lea.vmem %s797_s17, 16  ;;  %s977_s22 = scalar_lea.vmem %s797_s17, 32 }
 0x3d6   :  { %p974_p5 = scmp.ne.s32.totalorder %s797_s17, %s973_s1  ;;  %p978_p6 = scmp.lt.s32.totalorder %s797_s17, %s797_s17 }
 0x3d7   :  { %p979_p7 = scmp.lt.s32.totalorder %s977_s22, %s973_s1 }
 0x3d9   :  { %p980_p8 = por %p979_p7, %p978_p6 }
 0x3db   :  { %p981_p9 = pnand %p980_p8, %p974_p5 }
 0x3dd   :  { %984 = shalt.err (!%p981_p9)
}
 0x3de   :  { %799 = dma.vmem_to_hbm [thread:$0]  %s797_s17, 16, %s1517_s7, [#allocation6]   ;;  %v1015_v33 = vmov 1966171168   ;;  %v658_v54 = vld [vmem:[%s1513_s3] sm:$0x3] }
 0x3df   :  { %v725_v34 = vunpack.c.l.s4 %v1015_v33  ;;  %v747_v55 = vsub.s32 1, %v1410_v38  ;;  %v755_v52 = vld [vmem:[%s1514_s4] sm:$0x3] }
 0x3e0   :  { %v760_v57 = vrot.slane %v755_v52, %v1415_v42 }
 0x3e1   :  { %v726_v39 = vunpack.c.0.s8 %v725_v34  ;;  %v764_v60 = vrot.slane %v755_v52, %v747_v55 }
 0x3e3   :  { %v729_v44 = vsub.s32 %v726_v39, %v1410_v38 }
 0x428   :  { %v666_v12 = vpop.permute.xlu0 %665  ;;  %v663_v13 = vpop.permute.xlu1 %662 }
 0x429   :  { %v707_v14 = vsel %vm476_vm3, %v952_v11, %v663_v13 }
 0x42a   :  { %v708_v15 = vsel %vm534_vm5, %v707_v14, %v666_v12 }
 0x42c   :  { %v672_v9 = vpop.permute.xlu0 %671  ;;  %v669_v16 = vpop.permute.xlu1 %668 }
 0x42d   :  { %v709_v17 = vsel %vm536_vm6, %v708_v15, %v669_v16 }
 0x42e   :  { %v710_v19 = vsel %vm538_vm7, %v709_v17, %v672_v9 }
 0x430   :  { %v678_v18 = vpop.permute.xlu0 %677  ;;  %v675_v20 = vpop.permute.xlu1 %674 }
 0x431   :  { %v711_v21 = vsel %vm540_vm8, %v710_v19, %v675_v20 }
 0x432   :  { %v712_v23 = vsel %vm542_vm9, %v711_v21, %v678_v18 }
 0x434   :  { %v684_v22 = vpop.permute.xlu0 %683  ;;  %v681_v24 = vpop.permute.xlu1 %680 }
 0x435   :  { %v713_v25 = vsel %vm544_vm10, %v712_v23, %v681_v24 }
 0x436   :  { %v714_v27 = vsel %vm546_vm11, %v713_v25, %v684_v22 }
 0x438   :  { %v690_v26 = vpop.permute.xlu0 %689  ;;  %v687_v28 = vpop.permute.xlu1 %686 }
 0x439   :  { %v715_v29 = vsel %vm548_vm12, %v714_v27, %v687_v28 }
 0x43a   :  { %v716_v31 = vsel %vm25_vm0, %v715_v29, %v690_v26 }
 0x43c   :  { %v696_v30 = vpop.permute.xlu0 %695  ;;  %v693_v32 = vpop.permute.xlu1 %692 }
 0x43d   :  { %v717_v35 = vsel %vm551_vm13, %v716_v31, %v693_v32 }
 0x43e   :  { %v718_v36 = vsel %vm553_vm14, %v717_v35, %v696_v30 }
 0x440   :  { %v699_v37 = vpop.permute.xlu1 %698  ;;  %v702_v40 = vpop.permute.xlu0 %701 }
 0x441   :  { %v719_v41 = vsel %vm555_vm15, %v718_v36, %v699_v37 }
 0x442   :  { %v720_v43 = vsel %vm557_vm1, %v719_v41, %v702_v40 }
 0x444   :  { %v705_v45 = vpop.permute.xlu1 %704 }
 0x445   :  { %v721_v46 = vsel %vm559_vm2, %v720_v43, %v705_v45 }
 0x446   :  { %v723_v47 = vcombine.low %v721_v46, %v721_v46 }
 0x448   :  { %v730_v48 = vrot.slane %v723_v47, %v729_v44 }
 0x44a   :  { %v737_v50 = vrot.slane %v730_v48, %v729_v44 }
 0x44c   :  { %v739_v56 = vmul.f32 %v737_v50, %v658_v54 }
 0x44e   :  { %v744_v61 = vrot.slane %v739_v56, %v1415_v42  ;;  %v748_v63 = vrot.slane %v739_v56, %v747_v55 }
 0x450   :  { %v751_v0 = vmul.f32 %v744_v61, %v1423_v49  ;;  %v752_v58 = vmul.f32 %v748_v63, %v1427_v51  ;;  %v753_v62 = vmul.f32 %v744_v61, %v1439_v59  ;;  %v754_v38 = vmul.f32 %v748_v63, %v1431_v53 }
 0x452   :  { %v767_v1 = vadd.f32 %v760_v57, %v751_v0  ;;  %v768_v2 = vadd.f32 %v764_v60, %v752_v58  ;;  %v769_v3 = vadd.f32 %v760_v57, %v753_v62  ;;  %v770_v4 = vadd.f32 %v764_v60, %v754_v38 }
 0x454   :  { %771 = vst [vmem:[%s1515_s5] sm:$0xff] %v767_v1  ;;  %772 = vst [vmem:[%s1515_s5 + $0x8] sm:$0xff] %v768_v2 }
 0x455   :  { %773 = vst [vmem:[%s1515_s5 + $0x10] sm:$0xff] %v769_v3  ;;  %774 = vst [vmem:[%s1515_s5 + $0x18] sm:$0xff] %v770_v4 }
 0x456   :  { %993 = dma.done.wait [#allocation4], 16  }
 0x457   :  { %994 = vsyncadd [#allocation4], 4294967280 }
 0x458   :  { %995 = dma.done.wait [#allocation6], 16  }
 0x459   :  { %996 = vsyncadd [#allocation6], 4294967280 }
 0x45a   :  { %808 = vsyncpa [#allocation4], 1 }
 0x45b   :  { %809 = vsyncpa [#allocation6], 1 }

</bundles_post_ra>
